<compile_context>
chip_gen: v7x
topology: tpu7x:2x2x1
jax: 0.10.0
libtpu: 0.0.40
codegen_flags: <defaults>
</compile_context>

<pallas_src>
import jax
import jax.numpy as jnp
from jax import lax
from jax.experimental import pallas as pl


LANE = 128  # pad K and the logits lane dim to this for lane-dense layout


# ----------------------------------------------------------------------------
# Fused kernel: im2col-conv + bias + ReLU + GAP (as matmul) + folded linear
# ----------------------------------------------------------------------------
def _fused_kernel(patches_ref, wconv_ref, bconv_ref, pool_ref,
                  wcomb_ref, bcomb_ref, out_ref):
    # patches_ref: (B*H*W, Kpad)  im2col'd, zero-padded along K
    # wconv_ref:   (Kpad, Cout)   flattened conv weights, zero-padded along K
    # bconv_ref:   (1, Cout)      conv bias
    # pool_ref:    (B, B*H*W)     per-batch pooling matrix (entries 1/(H*W))
    # wcomb_ref:   (Cout, Npad)   w_head @ w_lin, zero-padded along N
    # bcomb_ref:   (1, Npad)      b_head @ w_lin + b_lin, zero-padded along N
    # out_ref:     (B, Npad)      padded logits
    acc = jnp.dot(patches_ref[...], wconv_ref[...],
                  preferred_element_type=jnp.float32)          # (B*H*W, Cout)
    acc = jnp.maximum(acc + bconv_ref[0, :], 0.0)              # bias + ReLU
    pooled = jnp.dot(pool_ref[...], acc,
                     preferred_element_type=jnp.float32)       # (B, Cout), mean
    out_ref[...] = jnp.dot(pooled, wcomb_ref[...],
                           preferred_element_type=jnp.float32) + bcomb_ref[0, :]


# ----------------------------------------------------------------------------
# One-time parameter preparation (weight folding / padding)
# ----------------------------------------------------------------------------
def prepare_params(params):
    kh, kw, cin, cout = params["w_conv"].shape
    k = kh * kw * cin
    w_mat = params["w_conv"].reshape(k, cout).astype(jnp.float32)
    w_mat = jnp.pad(w_mat, ((0, LANE - k), (0, 0)))            # (LANE, Cout)
    b_conv = params["b_conv"].astype(jnp.float32).reshape(1, cout)

    # Exact fold of the two bias-affine layers (no nonlinearity in between).
    w_comb = params["w_head"].astype(jnp.float32) @ params["w_lin"].astype(jnp.float32)
    b_comb = params["b_head"].astype(jnp.float32) @ params["w_lin"].astype(jnp.float32) \
        + params["b_lin"].astype(jnp.float32)
    ncls = w_comb.shape[1]
    npad = max(LANE, ncls)
    w_comb = jnp.pad(w_comb, ((0, 0), (0, npad - ncls)))       # (Cout, Npad)
    b_comb = jnp.pad(b_comb, (0, npad - ncls)).reshape(1, npad)

    return {"w_mat": w_mat, "b_conv": b_conv,
            "w_comb": w_comb, "b_comb": b_comb,
            "k": k, "ncls": ncls}


# ----------------------------------------------------------------------------
# Forward wrapper
# ----------------------------------------------------------------------------
def m_model_forward(x_nchw, prepped):
    B, Cin, H, W = x_nchw.shape
    HW = H * W
    kpad = prepped["w_mat"].shape[0]
    cout = prepped["w_mat"].shape[1]
    npad = prepped["w_comb"].shape[1]

    # layout: accept NCHW like PyTorch; build a lane-dense im2col matrix.
    x = jnp.transpose(x_nchw, (0, 2, 3, 1)).astype(jnp.float32)        # NHWC
    x_pad = jnp.pad(x, ((0, 0), (1, 1), (1, 1), (0, 0)))
    cols = [x_pad[:, dy:dy + H, dx:dx + W, :]
            for dy in range(3) for dx in range(3)]
    patches = jnp.concatenate(cols, axis=-1).reshape(B * HW, 9 * Cin)
    patches = jnp.pad(patches, ((0, 0), (0, kpad - 9 * Cin)))          # (B*HW, LANE)

    # Pooling matrix: row b selects the HW pixels of batch b, scaled by 1/HW
    # (folds the global-average-pool mean into an MXU matmul).
    row_ids = lax.broadcasted_iota(jnp.int32, (B, B * HW), 0)
    col_ids = lax.broadcasted_iota(jnp.int32, (B, B * HW), 1)
    pool = jnp.where(col_ids // HW == row_ids, 1.0 / HW, 0.0).astype(jnp.float32)

    logits_pad = pl.pallas_call(
        _fused_kernel,
        out_shape=jax.ShapeDtypeStruct((B, npad), jnp.float32),
        in_specs=[
            pl.BlockSpec((B * HW, kpad), lambda: (0, 0)),
            pl.BlockSpec((kpad, cout), lambda: (0, 0)),
            pl.BlockSpec((1, cout), lambda: (0, 0)),
            pl.BlockSpec((B, B * HW), lambda: (0, 0)),
            pl.BlockSpec((cout, npad), lambda: (0, 0)),
            pl.BlockSpec((1, npad), lambda: (0, 0)),
        ],
        out_specs=pl.BlockSpec((B, npad), lambda: (0, 0)),
    )(patches, prepped["w_mat"], prepped["b_conv"], pool,
      prepped["w_comb"], prepped["b_comb"])

    return logits_pad[:, :prepped["ncls"]]


# ----------------------------------------------------------------------------
# Pure-JAX reference (un-fused, original parameterization)
# ----------------------------------------------------------------------------
def _reference(x_nchw, params):
    x = jnp.transpose(x_nchw, (0, 2, 3, 1)).astype(jnp.float32)
    y = lax.conv_general_dilated(
        x, params["w_conv"], window_strides=(1, 1), padding="SAME",
        dimension_numbers=("NHWC", "HWIO", "NHWC"))
    y = jnp.maximum(y + params["b_conv"], 0.0)
    pooled = jnp.mean(y, axis=(1, 2))
    feats = pooled @ params["w_head"] + params["b_head"]
    return feats @ params["w_lin"] + params["b_lin"]


if __name__ == "__main__":
    # Small, forward-consistent shapes: batch=2, in_chans=3, spatial=16,
    # stem width=32, backbone feature dim=1000, num_classes=5.
    B, Cin, Hs, Ws = 2, 3, 16, 16
    Cstem, in_features, num_classes = 32, 1000, 5

    key = jax.random.PRNGKey(0)
    k0, k1, k2, k3 = jax.random.split(key, 4)
    params = {
        "w_conv": jax.random.normal(k0, (3, 3, Cin, Cstem), jnp.float32) * 0.1,
        "b_conv": jnp.linspace(-0.1, 0.1, Cstem, dtype=jnp.float32),
        "w_head": jax.random.normal(k1, (Cstem, in_features), jnp.float32) * 0.05,
        "b_head": jnp.zeros((in_features,), jnp.float32),
        "w_lin": jax.random.normal(k2, (in_features, num_classes), jnp.float32) * 0.03,
        "b_lin": jnp.linspace(-0.05, 0.05, num_classes, dtype=jnp.float32),
    }
    x = jax.random.normal(k3, (B, Cin, Hs, Ws), jnp.float32)

    prepped = prepare_params(params)           # one-time weight folding/padding
    out = jax.block_until_ready(m_model_forward(x, prepped))
    ref = jax.block_until_ready(_reference(x, params))
    assert out.shape == (B, num_classes)
    assert jnp.allclose(out, ref, atol=1e-3, rtol=1e-3), (out, ref)
    print("KERNEL_OK")
</pallas_src>

<mosaic_0001>
module attributes {stable_mosaic.version = 11 : i64} {
  func.func @_fused_kernel(%arg0: memref<512x128xf32, #tpu.memory_space<vmem>>, %arg1: memref<128x32xf32, #tpu.memory_space<vmem>>, %arg2: memref<1x32xf32, #tpu.memory_space<vmem>>, %arg3: memref<2x512xf32, #tpu.memory_space<vmem>>, %arg4: memref<32x128xf32, #tpu.memory_space<vmem>>, %arg5: memref<1x128xf32, #tpu.memory_space<vmem>>, %arg6: memref<2x128xf32, #tpu.memory_space<vmem>>) attributes {dimension_semantics = [], scalar_prefetch = 0 : i64, scratch_operands = 0 : i64, tpu.core_type = #tpu.core_type<tc>} {
    %c0 = arith.constant 0 : index
    %c0_0 = arith.constant 0 : index
    %0 = vector.load %arg0[%c0, %c0_0] : memref<512x128xf32, #tpu.memory_space<vmem>>, vector<512x128xf32>
    %c0_1 = arith.constant 0 : index
    %c0_2 = arith.constant 0 : index
    %1 = vector.load %arg1[%c0_1, %c0_2] : memref<128x32xf32, #tpu.memory_space<vmem>>, vector<128x32xf32>
    %cst = arith.constant dense<0.000000e+00> : vector<512x32xf32>
    %2 = tpu.matmul %0, %1, %cst {dimension_numbers = #tpu.dot_dimension_numbers<[1], [0], [0], [1], [0, 0, 1, 1], [], []>} : vector<512x128xf32>, vector<128x32xf32>, vector<512x32xf32> -> vector<512x32xf32>
    %c0_3 = arith.constant 0 : index
    %c0_4 = arith.constant 0 : index
    %3 = vector.load %arg2[%c0_3, %c0_4] : memref<1x32xf32, #tpu.memory_space<vmem>>, vector<1x32xf32>
    %4 = vector.shape_cast %3 : vector<1x32xf32> to vector<32xf32>
    %5 = vector.shape_cast %4 : vector<32xf32> to vector<1x32xf32>
    %6 = vector.broadcast %5 : vector<1x32xf32> to vector<512x32xf32>
    %7 = arith.addf %2, %6 : vector<512x32xf32>
    %cst_5 = arith.constant 0.000000e+00 : f32
    %8 = vector.broadcast %cst_5 : f32 to vector<512x32xf32>
    %9 = arith.maximumf %7, %8 : vector<512x32xf32>
    %c0_6 = arith.constant 0 : index
    %c0_7 = arith.constant 0 : index
    %10 = vector.load %arg3[%c0_6, %c0_7] : memref<2x512xf32, #tpu.memory_space<vmem>>, vector<2x512xf32>
    %cst_8 = arith.constant dense<0.000000e+00> : vector<2x32xf32>
    %11 = tpu.matmul %10, %9, %cst_8 {dimension_numbers = #tpu.dot_dimension_numbers<[1], [0], [0], [1], [0, 0, 1, 1], [], []>} : vector<2x512xf32>, vector<512x32xf32>, vector<2x32xf32> -> vector<2x32xf32>
    %c0_9 = arith.constant 0 : index
    %c0_10 = arith.constant 0 : index
    %12 = vector.load %arg4[%c0_9, %c0_10] : memref<32x128xf32, #tpu.memory_space<vmem>>, vector<32x128xf32>
    %cst_11 = arith.constant dense<0.000000e+00> : vector<2x128xf32>
    %13 = tpu.matmul %11, %12, %cst_11 {dimension_numbers = #tpu.dot_dimension_numbers<[1], [0], [0], [1], [0, 0, 1, 1], [], []>} : vector<2x32xf32>, vector<32x128xf32>, vector<2x128xf32> -> vector<2x128xf32>
    %c0_12 = arith.constant 0 : index
    %c0_13 = arith.constant 0 : index
    %14 = vector.load %arg5[%c0_12, %c0_13] : memref<1x128xf32, #tpu.memory_space<vmem>>, vector<1x128xf32>
    %15 = vector.shape_cast %14 : vector<1x128xf32> to vector<128xf32>
    %16 = vector.shape_cast %15 : vector<128xf32> to vector<1x128xf32>
    %17 = vector.broadcast %16 : vector<1x128xf32> to vector<2x128xf32>
    %18 = arith.addf %13, %17 : vector<2x128xf32>
    %c0_14 = arith.constant 0 : index
    %c0_15 = arith.constant 0 : index
    %19 = vector.load %arg6[%c0_14, %c0_15] : memref<2x128xf32, #tpu.memory_space<vmem>>, vector<2x128xf32>
    tpu.vector_store %arg6[%c0_14, %c0_15], %18 {strides = array<i32>} : memref<2x128xf32, #tpu.memory_space<vmem>>, vector<2x128xf32>,
    return
  }
}

</mosaic_0001>

<bundles_post_ra>
// kernel: tpu_custom_call.1
= control target key start
LH: loop header
LB: loop body
LE: loop exit
PB: predicated region body
PF: predicated region fallthrough
CT: control target
= control target key end

     0   :  { %11 = vsyncpa [#allocation3], 0  ;;  %s1576_s0 = inlined_call_operand.hbm [shape: f32[512,128], index: 0, kind: input, shape index: {}]   ;;  %s1577_s1 = inlined_call_operand.vmem [shape: f32[128,32], index: 1, kind: input, shape index: {}]   ;;  %s1578_s2 = inlined_call_operand.vmem [shape: f32[1,32], index: 2, kind: input, shape index: {}]   ;;  %s1579_s3 = inlined_call_operand.vmem [shape: f32[2,512], index: 3, kind: input, shape index: {}]   ;;  %s1580_s4 = inlined_call_operand.vmem [shape: f32[32,128], index: 4, kind: input, shape index: {}]   ;;  %s1581_s5 = inlined_call_operand.vmem [shape: f32[1,128], index: 5, kind: input, shape index: {}]   ;;  %s1582_s6 = inlined_call_operand.hbm [shape: f32[2,128], index: 6, kind: output, shape index: {}]  }
   0x1   :  { %12 = vsyncpa [#allocation4], 0  ;;  %s1310_s21 = smov [#allocation2]   ;;  %s1262_s25 = scalar_lea.hbm %s1576_s0, 8192 }
   0x2   :  { %s18_s22 = sshll.u32 %s1310_s21, 4  ;;  %p1263_p0 = scmp.ne.s32.totalorder %s1576_s0, %s1262_s25  ;;  %s19_s22 = int_to_ptr.vmem [resolvable:$true] %s18_s22 }
   0x3   :  { %p1266_p1 = scmp.lt.u32.totalorder %s1262_s25, %s1576_s0 }
   0x5   :  { %p1268_p2 = pnand %p1266_p1, %p1263_p0 }
   0x7   :  { %1271 = shalt.err (!%p1268_p2)
}
   0x8   :  { %s1272_s30 = scalar_lea.vmem %s19_s22, 8192  ;;  %p1277_p4 = scmp.lt.s32.totalorder %s19_s22, %s19_s22 }
   0x9   :  { %p1273_p3 = scmp.ne.s32.totalorder %s19_s22, %s1272_s30  ;;  %p1278_p5 = scmp.lt.s32.totalorder %s1272_s30, %s1272_s30 }
   0xb   :  { %p1279_p6 = por %p1278_p5, %p1277_p4 }
   0xd   :  { %p1280_p7 = pnand %p1279_p6, %p1273_p3 }
   0xf   :  { %1283 = shalt.err (!%p1280_p7)
}
  0x10   :  { %s1311_s7 = smov 128   ;;  %s1312_s8 = smov 8  }
  0x11   :  { %24 = dma.hbm_to_vmem [thread:$0]  %s1576_s0, 8192, %s19_s22, [#allocation3], %s1311_s7, %s1311_s7, %s1312_s8  }
  0x12   :  { %1306 = dma.done.wait [#allocation3], 8192  }
  0x13   :  { %1307 = vsyncadd [#allocation3], 4294959104  ;;  %v102_v0 = vld [vmem:[%s1577_s1] sm:$0xff]  ;;  %v103_v1 = vld [vmem:[%s1577_s1 + $0x8] sm:$0xff]  ;;  %vm1315_vm0 = vmmov 0   ;;  %vm748_vm1 = vcmask 261120  }
  0x14   :  { %v104_v2 = vld [vmem:[%s1577_s1 + $0x10] sm:$0xff]  ;;  %v1135_v3 = vpack.c.bf16 %v103_v1, %v102_v0  ;;  %v105_v4 = vld [vmem:[%s1577_s1 + $0x18] sm:$0xff]  ;;  %v106_v6 = vld [vmem:[%s1577_s1 + $0x20] sm:$0xff]  ;;  %s1317_s28 = smov [#allocation5]  }
  0x15   :  { %v1139_v5 = vpack.c.bf16 %v105_v4, %v104_v2  ;;  %v107_v7 = vld [vmem:[%s1577_s1 + $0x28] sm:$0xff]  ;;  %v38_v9 = vld [vmem:[#allocation2] sm:$0xff]  ;;  %v108_v10 = vld [vmem:[%s1577_s1 + $0x30] sm:$0xff] }
  0x16   :  { %1136 = vmatprep.subr.bf16.mxu0 %v1135_v3  ;;  %1237 = vmatprep.subr.bf16.mxu1 %v1135_v3  ;;  %v1143_v8 = vpack.c.bf16 %v107_v7, %v106_v6  ;;  %v109_v11 = vld [vmem:[%s1577_s1 + $0x38] sm:$0xff]  ;;  %v110_v13 = vld [vmem:[%s1577_s1 + $0x40] sm:$0xff]  ;;  %v111_v14 = vld [vmem:[%s1577_s1 + $0x48] sm:$0xff] }
  0x17   :  { %1138 = vmatpush3.bf16.msra.mxu0 %v1135_v3  ;;  %1245 = vmatpush3.bf16.msra.mxu1 %v1135_v3  ;;  %v1147_v12 = vpack.c.bf16 %v109_v11, %v108_v10  ;;  %v1151_v15 = vpack.c.bf16 %v111_v14, %v110_v13  ;;  %v112_v16 = vld [vmem:[%s1577_s1 + $0x50] sm:$0xff]  ;;  %v113_v17 = vld [vmem:[%s1577_s1 + $0x58] sm:$0xff]  ;;  %v82_v18 = vld [vmem:[#allocation2 + $0x160] sm:$0xff] }
  0x18   :  { %1140 = vmatprep.subr.bf16.mxu0 %v1139_v5  ;;  %1238 = vmatprep.subr.bf16.mxu1 %v1139_v5  ;;  %v1155_v19 = vpack.c.bf16 %v113_v17, %v112_v16  ;;  %v114_v20 = vld [vmem:[%s1577_s1 + $0x60] sm:$0xff]  ;;  %v115_v21 = vld [vmem:[%s1577_s1 + $0x68] sm:$0xff]  ;;  %v116_v23 = vld [vmem:[%s1577_s1 + $0x70] sm:$0xff] }
  0x19   :  { %1028 = vmatprep.mubr.f32.mxu0 %v38_v9  ;;  %1094 = vmatprep.mubr.f32.mxu1 %v82_v18  ;;  %v1159_v22 = vpack.c.bf16 %v115_v21, %v114_v20  ;;  %v117_v24 = vld [vmem:[%s1577_s1 + $0x78] sm:$0xff]  ;;  %v39_v26 = vld [vmem:[#allocation2 + $0x8] sm:$0xff]  ;;  %v40_v28 = vld [vmem:[#allocation2 + $0x10] sm:$0xff] }
  0x1a   :  { %v1163_v25 = vpack.c.bf16 %v117_v24, %v116_v23  ;;  %v83_v27 = vld [vmem:[#allocation2 + $0x168] sm:$0xff]  ;;  %v84_v29 = vld [vmem:[#allocation2 + $0x170] sm:$0xff]  ;;  %v41_v30 = vld [vmem:[#allocation2 + $0x18] sm:$0xff]  ;;  %v1313_v24 = vmov 1983009808  }
  0x1b   :  { %1142 = vmatpush3.bf16.msra.mxu0 %v1139_v5  ;;  %1246 = vmatpush3.bf16.msra.mxu1 %v1139_v5  ;;  %v85_v31 = vld [vmem:[#allocation2 + $0x178] sm:$0xff]  ;;  %v42_v32 = vld [vmem:[#allocation2 + $0x20] sm:$0xff]  ;;  %v43_v34 = vld [vmem:[#allocation2 + $0x28] sm:$0xff] }
  0x1c   :  { %1144 = vmatprep.subr.bf16.mxu0 %v1143_v8  ;;  %1239 = vmatprep.subr.bf16.mxu1 %v1143_v8  ;;  %v86_v33 = vld [vmem:[#allocation2 + $0x180] sm:$0xff]  ;;  %v87_v35 = vld [vmem:[#allocation2 + $0x188] sm:$0xff]  ;;  %v44_v36 = vld [vmem:[#allocation2 + $0x30] sm:$0xff] }
  0x1d   :  { %v88_v37 = vld [vmem:[#allocation2 + $0x190] sm:$0xff]  ;;  %v45_v38 = vld [vmem:[#allocation2 + $0x38] sm:$0xff]  ;;  %v46_v40 = vld [vmem:[#allocation2 + $0x40] sm:$0xff] }
  0x1e   :  { %v89_v39 = vld [vmem:[#allocation2 + $0x198] sm:$0xff]  ;;  %v90_v41 = vld [vmem:[#allocation2 + $0x1a0] sm:$0xff]  ;;  %v47_v42 = vld [vmem:[#allocation2 + $0x48] sm:$0xff] }
  0x1f   :  { %1146 = vmatpush3.bf16.msra.mxu0 %v1143_v8  ;;  %1247 = vmatpush3.bf16.msra.mxu1 %v1143_v8  ;;  %v91_v43 = vld [vmem:[#allocation2 + $0x1a8] sm:$0xff]  ;;  %v48_v44 = vld [vmem:[#allocation2 + $0x50] sm:$0xff]  ;;  %v49_v46 = vld [vmem:[#allocation2 + $0x58] sm:$0xff] }
  0x20   :  { %1148 = vmatprep.subr.bf16.mxu0 %v1147_v12  ;;  %1240 = vmatprep.subr.bf16.mxu1 %v1147_v12  ;;  %v92_v45 = vld [vmem:[#allocation2 + $0x1b0] sm:$0xff]  ;;  %v93_v47 = vld [vmem:[#allocation2 + $0x1b8] sm:$0xff]  ;;  %v50_v48 = vld [vmem:[#allocation2 + $0x60] sm:$0xff] }
  0x21   :  { %v94_v49 = vld [vmem:[#allocation2 + $0x1c0] sm:$0xff]  ;;  %v51_v50 = vld [vmem:[#allocation2 + $0x68] sm:$0xff]  ;;  %v52_v52 = vld [vmem:[#allocation2 + $0x70] sm:$0xff] }
  0x22   :  { %v95_v51 = vld [vmem:[#allocation2 + $0x1c8] sm:$0xff]  ;;  %v96_v53 = vld [vmem:[#allocation2 + $0x1d0] sm:$0xff]  ;;  %v53_v54 = vld [vmem:[#allocation2 + $0x78] sm:$0xff] }
  0x23   :  { %1150 = vmatpush3.bf16.msra.mxu0 %v1147_v12  ;;  %1248 = vmatpush3.bf16.msra.mxu1 %v1147_v12  ;;  %v97_v55 = vld [vmem:[#allocation2 + $0x1d8] sm:$0xff]  ;;  %v54_v56 = vld [vmem:[#allocation2 + $0x80] sm:$0xff]  ;;  %v55_v58 = vld [vmem:[#allocation2 + $0x88] sm:$0xff] }
  0x24   :  { %1152 = vmatprep.subr.bf16.mxu0 %v1151_v15  ;;  %1241 = vmatprep.subr.bf16.mxu1 %v1151_v15  ;;  %v98_v57 = vld [vmem:[#allocation2 + $0x1e0] sm:$0xff]  ;;  %v99_v59 = vld [vmem:[#allocation2 + $0x1e8] sm:$0xff]  ;;  %v56_v60 = vld [vmem:[#allocation2 + $0x90] sm:$0xff] }
  0x25   :  { %v100_v61 = vld [vmem:[#allocation2 + $0x1f0] sm:$0xff]  ;;  %v57_v62 = vld [vmem:[#allocation2 + $0x98] sm:$0xff]  ;;  %v58_v0 = vld [vmem:[#allocation2 + $0xa0] sm:$0xff] }
  0x26   :  { %v101_v63 = vld [vmem:[#allocation2 + $0x1f8] sm:$0xff]  ;;  %v59_v1 = vld [vmem:[#allocation2 + $0xa8] sm:$0xff]  ;;  %v60_v2 = vld [vmem:[#allocation2 + $0xb0] sm:$0xff] }
  0x27   :  { %1154 = vmatpush3.bf16.msra.mxu0 %v1151_v15  ;;  %1249 = vmatpush3.bf16.msra.mxu1 %v1151_v15  ;;  %v61_v3 = vld [vmem:[#allocation2 + $0xb8] sm:$0xff]  ;;  %v62_v4 = vld [vmem:[#allocation2 + $0xc0] sm:$0xff]  ;;  %v63_v5 = vld [vmem:[#allocation2 + $0xc8] sm:$0xff] }
  0x28   :  { %1156 = vmatprep.subr.bf16.mxu0 %v1155_v19  ;;  %1242 = vmatprep.subr.bf16.mxu1 %v1155_v19  ;;  %v64_v6 = vld [vmem:[#allocation2 + $0xd0] sm:$0xff]  ;;  %v65_v7 = vld [vmem:[#allocation2 + $0xd8] sm:$0xff]  ;;  %v66_v8 = vld [vmem:[#allocation2 + $0xe0] sm:$0xff] }
  0x29   :  { %v67_v9 = vld [vmem:[#allocation2 + $0xe8] sm:$0xff]  ;;  %v68_v10 = vld [vmem:[#allocation2 + $0xf0] sm:$0xff]  ;;  %v69_v11 = vld [vmem:[#allocation2 + $0xf8] sm:$0xff] }
  0x2a   :  { %v70_v12 = vld [vmem:[#allocation2 + $0x100] sm:$0xff]  ;;  %v71_v13 = vld [vmem:[#allocation2 + $0x108] sm:$0xff]  ;;  %v72_v14 = vld [vmem:[#allocation2 + $0x110] sm:$0xff] }
  0x2b   :  { %1158 = vmatpush3.bf16.msra.mxu0 %v1155_v19  ;;  %1250 = vmatpush3.bf16.msra.mxu1 %v1155_v19  ;;  %v73_v15 = vld [vmem:[#allocation2 + $0x118] sm:$0xff]  ;;  %v74_v16 = vld [vmem:[#allocation2 + $0x120] sm:$0xff]  ;;  %v75_v17 = vld [vmem:[#allocation2 + $0x128] sm:$0xff] }
  0x2c   :  { %1160 = vmatprep.subr.bf16.mxu0 %v1159_v22  ;;  %1243 = vmatprep.subr.bf16.mxu1 %v1159_v22  ;;  %v76_v18 = vld [vmem:[#allocation2 + $0x130] sm:$0xff]  ;;  %v77_v19 = vld [vmem:[#allocation2 + $0x138] sm:$0xff]  ;;  %v78_v20 = vld [vmem:[#allocation2 + $0x140] sm:$0xff] }
  0x2d   :  { %v79_v21 = vld [vmem:[#allocation2 + $0x148] sm:$0xff]  ;;  %v81_v23 = vld [vmem:[#allocation2 + $0x158] sm:$0xff] }
  0x2f   :  { %1162 = vmatpush3.bf16.msra.mxu0 %v1159_v22  ;;  %1251 = vmatpush3.bf16.msra.mxu1 %v1159_v22  ;;  %v80_v22 = vld [vmem:[#allocation2 + $0x150] sm:$0xff] }
  0x30   :  { %1164 = vmatprep.subr.bf16.mxu0 %v1163_v25  ;;  %1244 = vmatprep.subr.bf16.mxu1 %v1163_v25 }
  0x33   :  { %1166 = vmatpush3.bf16.msra.mxu0 %v1163_v25  ;;  %1252 = vmatpush3.bf16.msra.mxu1 %v1163_v25  ;;  %v578_v25 = vunpack.c.l.s4 %v1313_v24 }
  0x36   :  { %1029 = vmatmul.mubr.f32.vlgmr.msra.gmra.mrb[0].mxu0 %v39_v26  ;;  %1095 = vmatmul.mubr.f32.vlgmr.msra.gmra.mrb[0].mxu1 %v83_v27  ;;  %v580_v26 = vlaneseq  ;;  %v579_v27 = vunpack.c.0.s8 %v578_v25 }
  0x37   :  { %1031 = vmatprep.mubr.f32.mxu0 %v40_v28  ;;  %1097 = vmatprep.mubr.f32.mxu1 %v84_v29 }
  0x38   :  { %v581_v28 = vshrl.u32 %v580_v26, 7 }
  0x3a   :  { %1032 = vmatmul.mubr.f32.gmra.mrb[2].mxu0 %v41_v30  ;;  %1098 = vmatmul.mubr.f32.gmra.mrb[2].mxu1 %v85_v31  ;;  %v582_v29 = vsub.s32 %v579_v27, %v581_v28  ;;  %v574_v30 = vld [vmem:[%s1579_s3] sm:$0xff] }
  0x3b   :  { %1034 = vmatprep.mubr.f32.mxu0 %v42_v32  ;;  %1100 = vmatprep.mubr.f32.mxu1 %v86_v33  ;;  %v576_v33 = vcombine.high %v574_v30, %v574_v30 }
  0x3c   :  { %v1416_v31 = vrot.slane %v574_v30, %v582_v29 }
  0x3e   :  { %1035 = vmatmul.mubr.f32.gmra.mrb[4].mxu0 %v43_v34  ;;  %1101 = vmatmul.mubr.f32.gmra.mrb[4].mxu1 %v87_v35  ;;  %v591_v32 = vcombine.high %v1416_v31, %v1416_v31  ;;  %v1420_v34 = vrot.slane %v576_v33, %v582_v29  ;;  %v1425_v35 = vld [vmem:[%s1578_s2] ss:$0 sm:$0xff] }
  0x3f   :  { %1037 = vmatprep.mubr.f32.mxu0 %v44_v36  ;;  %1103 = vmatprep.mubr.f32.mxu1 %v88_v37 }
  0x42   :  { %1038 = vmatmul.mubr.f32.gmra.mrb[6].mxu0 %v45_v38  ;;  %1104 = vmatmul.mubr.f32.gmra.mrb[6].mxu1 %v89_v39 }
  0x43   :  { %1040 = vmatprep.mubr.f32.mxu0 %v46_v40  ;;  %1106 = vmatprep.mubr.f32.mxu1 %v90_v41 }
  0x46   :  { %1041 = vmatmul.mubr.f32.gmra.mrb[8].mxu0 %v47_v42  ;;  %1107 = vmatmul.mubr.f32.gmra.mrb[8].mxu1 %v91_v43 }
  0x47   :  { %1043 = vmatprep.mubr.f32.mxu0 %v48_v44  ;;  %1109 = vmatprep.mubr.f32.mxu1 %v92_v45 }
  0x4a   :  { %1044 = vmatmul.mubr.f32.gmra.mrb[10].mxu0 %v49_v46  ;;  %1110 = vmatmul.mubr.f32.gmra.mrb[10].mxu1 %v93_v47 }
  0x4b   :  { %1046 = vmatprep.mubr.f32.mxu0 %v50_v48  ;;  %1112 = vmatprep.mubr.f32.mxu1 %v94_v49 }
  0x4e   :  { %1047 = vmatmul.mubr.f32.gmra.mrb[12].mxu0 %v51_v50  ;;  %1113 = vmatmul.mubr.f32.gmra.mrb[12].mxu1 %v95_v51 }
  0x4f   :  { %1049 = vmatprep.mubr.f32.mxu0 %v52_v52  ;;  %1115 = vmatprep.mubr.f32.mxu1 %v96_v53 }
  0x52   :  { %1050 = vmatmul.mubr.f32.gmra.mrb[14].mxu0 %v53_v54  ;;  %1116 = vmatmul.mubr.f32.gmra.mrb[14].mxu1 %v97_v55 }
  0x53   :  { %1052 = vmatprep.mubr.f32.mxu0 %v54_v56  ;;  %1118 = vmatprep.mubr.f32.mxu1 %v98_v57 }
  0x56   :  { %1053 = vmatmul.mubr.f32.gmra.mrb[16].mxu0 %v55_v58  ;;  %1119 = vmatmul.mubr.f32.gmra.mrb[16].mxu1 %v99_v59 }
  0x57   :  { %1055 = vmatprep.mubr.f32.mxu0 %v56_v60  ;;  %1121 = vmatprep.mubr.f32.mxu1 %v100_v61 }
  0x5a   :  { %1056 = vmatmul.mubr.f32.gmra.mrb[18].mxu0 %v57_v62  ;;  %1122 = vmatmul.mubr.f32.gmra.mrb[18].mxu1 %v101_v63 }
  0x5b   :  { %1058 = vmatprep.mubr.f32.mxu0 %v58_v0  ;;  %661 = vmatprep.mubr.f32.mxu1 %v591_v32 }
  0x5e   :  { %1059 = vmatmul.mubr.f32.gmra.mrb[20].mxu0 %v59_v1 }
  0x5f   :  { %1061 = vmatprep.mubr.f32.mxu0 %v60_v2 }
  0x62   :  { %1062 = vmatmul.mubr.f32.gmra.mrb[22].mxu0 %v61_v3 }
  0x63   :  { %1064 = vmatprep.mubr.f32.mxu0 %v62_v4 }
  0x66   :  { %1065 = vmatmul.mubr.f32.gmra.mrb[24].mxu0 %v63_v5 }
  0x67   :  { %1067 = vmatprep.mubr.f32.mxu0 %v64_v6 }
  0x6a   :  { %1068 = vmatmul.mubr.f32.gmra.mrb[26].mxu0 %v65_v7 }
  0x6b   :  { %1070 = vmatprep.mubr.f32.mxu0 %v66_v8 }
  0x6e   :  { %1071 = vmatmul.mubr.f32.gmra.mrb[28].mxu0 %v67_v9 }
  0x6f   :  { %1073 = vmatprep.mubr.f32.mxu0 %v68_v10 }
  0x72   :  { %1074 = vmatmul.mubr.f32.gmra.mrb[30].mxu0 %v69_v11 }
  0x73   :  { %1076 = vmatprep.mubr.f32.mxu0 %v70_v12 }
  0x76   :  { %1077 = vmatmul.mubr.f32.gmra.mrb[32].mxu0 %v71_v13 }
  0x77   :  { %1079 = vmatprep.mubr.f32.mxu0 %v72_v14 }
  0x7a   :  { %1080 = vmatmul.mubr.f32.gmra.mrb[34].mxu0 %v73_v15 }
  0x7b   :  { %1082 = vmatprep.mubr.f32.mxu0 %v74_v16 }
  0x7e   :  { %1083 = vmatmul.mubr.f32.gmra.mrb[36].mxu0 %v75_v17 }
  0x7f   :  { %1085 = vmatprep.mubr.f32.mxu0 %v76_v18 }
  0x82   :  { %1086 = vmatmul.mubr.f32.gmra.mrb[38].mxu0 %v77_v19 }
  0x83   :  { %1088 = vmatprep.mubr.f32.mxu0 %v78_v20 }
  0x86   :  { %1089 = vmatmul.mubr.f32.gmra.mrb[40].mxu0 %v79_v21 }
  0x87   :  { %1091 = vmatprep.mubr.f32.mxu0 %v80_v22 }
  0x8a   :  { %1092 = vmatmul.mubr.f32.gmra.mrb[42].mxu0 %v81_v23 }
 0x109   :  { %v1030_v36 = vpop.f32.mrb[0].mxu0  ;;  %v1096_v37 = vpop.f32.mrb[0].mxu1 }
 0x10a   :  { %v197_v38 = vadd.f32 %v1030_v36, %v1425_v35  ;;  %v191_v39 = vpop.f32.mrb[1].mxu0  ;;  %v417_v40 = vadd.f32 %v1096_v37, %v1425_v35  ;;  %v411_v41 = vpop.f32.mrb[1].mxu1 }
 0x10b   :  { %v192_v42 = vadd.f32 %v1425_v35, %v191_v39  ;;  %v412_v43 = vadd.f32 %v1425_v35, %v411_v41 }
 0x10c   :  { %v511_v44 = vmax.f32 %v197_v38, 0.0  ;;  %v555_v45 = vmax.f32 %v417_v40, 0.0 }
 0x10d   :  { %v510_v46 = vmax.f32 %v192_v42, 0.0  ;;  %v1033_v47 = vpop.f32.mrb[2].mxu0  ;;  %v554_v48 = vmax.f32 %v412_v43, 0.0  ;;  %v1099_v49 = vpop.f32.mrb[2].mxu1 }
 0x10e   :  { %v207_v50 = vadd.f32 %v1033_v47, %v1425_v35  ;;  %v201_v51 = vpop.f32.mrb[3].mxu0  ;;  %v427_v52 = vadd.f32 %v1099_v49, %v1425_v35  ;;  %v421_v53 = vpop.f32.mrb[3].mxu1 }
 0x10f   :  { %v1433_v54 = vpack.c.bf16 %v511_v44, %v510_v46  ;;  %v202_v55 = vadd.f32 %v1425_v35, %v201_v51  ;;  %v1436_v56 = vpack.c.bf16 %v555_v45, %v554_v48  ;;  %v422_v57 = vadd.f32 %v1425_v35, %v421_v53 }
 0x110   :  { %v513_v58 = vmax.f32 %v207_v50, 0.0  ;;  %v557_v59 = vmax.f32 %v427_v52, 0.0 }
 0x111   :  { %v512_v60 = vmax.f32 %v202_v55, 0.0  ;;  %v1036_v61 = vpop.f32.mrb[4].mxu0  ;;  %v556_v62 = vmax.f32 %v422_v57, 0.0  ;;  %v1102_v63 = vpop.f32.mrb[4].mxu1 }
 0x112   :  { %v217_v0 = vadd.f32 %v1036_v61, %v1425_v35  ;;  %v211_v1 = vpop.f32.mrb[5].mxu0  ;;  %v437_v2 = vadd.f32 %v1102_v63, %v1425_v35  ;;  %v431_v3 = vpop.f32.mrb[5].mxu1 }
 0x113   :  { %v1441_v4 = vpack.c.bf16 %v513_v58, %v512_v60  ;;  %v212_v5 = vadd.f32 %v1425_v35, %v211_v1  ;;  %v1444_v6 = vpack.c.bf16 %v557_v59, %v556_v62  ;;  %v432_v7 = vadd.f32 %v1425_v35, %v431_v3 }
 0x114   :  { %v515_v8 = vmax.f32 %v217_v0, 0.0  ;;  %v559_v9 = vmax.f32 %v437_v2, 0.0 }
 0x115   :  { %v514_v10 = vmax.f32 %v212_v5, 0.0  ;;  %v1039_v11 = vpop.f32.mrb[6].mxu0  ;;  %v558_v12 = vmax.f32 %v432_v7, 0.0  ;;  %v1105_v13 = vpop.f32.mrb[6].mxu1 }
 0x116   :  { %v227_v14 = vadd.f32 %v1039_v11, %v1425_v35  ;;  %v221_v15 = vpop.f32.mrb[7].mxu0  ;;  %v447_v16 = vadd.f32 %v1105_v13, %v1425_v35  ;;  %v441_v17 = vpop.f32.mrb[7].mxu1 }
 0x117   :  { %v1449_v18 = vpack.c.bf16 %v515_v8, %v514_v10  ;;  %v222_v19 = vadd.f32 %v1425_v35, %v221_v15  ;;  %v1452_v20 = vpack.c.bf16 %v559_v9, %v558_v12  ;;  %v442_v21 = vadd.f32 %v1425_v35, %v441_v17 }
 0x118   :  { %v517_v22 = vmax.f32 %v227_v14, 0.0  ;;  %v561_v23 = vmax.f32 %v447_v16, 0.0 }
 0x119   :  { %v516_v24 = vmax.f32 %v222_v19, 0.0  ;;  %v1042_v25 = vpop.f32.mrb[8].mxu0  ;;  %v560_v26 = vmax.f32 %v442_v21, 0.0  ;;  %v1108_v27 = vpop.f32.mrb[8].mxu1 }
 0x11a   :  { %v237_v28 = vadd.f32 %v1042_v25, %v1425_v35  ;;  %v231_v29 = vpop.f32.mrb[9].mxu0  ;;  %v457_v30 = vadd.f32 %v1108_v27, %v1425_v35  ;;  %v451_v32 = vpop.f32.mrb[9].mxu1 }
 0x11b   :  { %v1457_v33 = vpack.c.bf16 %v517_v22, %v516_v24  ;;  %v232_v36 = vadd.f32 %v1425_v35, %v231_v29  ;;  %v1460_v37 = vpack.c.bf16 %v561_v23, %v560_v26  ;;  %v452_v38 = vadd.f32 %v1425_v35, %v451_v32 }
 0x11c   :  { %v519_v39 = vmax.f32 %v237_v28, 0.0  ;;  %v563_v40 = vmax.f32 %v457_v30, 0.0 }
 0x11d   :  { %v518_v41 = vmax.f32 %v232_v36, 0.0  ;;  %v1045_v42 = vpop.f32.mrb[10].mxu0  ;;  %v562_v43 = vmax.f32 %v452_v38, 0.0  ;;  %v1111_v44 = vpop.f32.mrb[10].mxu1 }
 0x11e   :  { %v247_v45 = vadd.f32 %v1045_v42, %v1425_v35  ;;  %v241_v46 = vpop.f32.mrb[11].mxu0  ;;  %v467_v47 = vadd.f32 %v1111_v44, %v1425_v35  ;;  %v461_v48 = vpop.f32.mrb[11].mxu1 }
 0x11f   :  { %v1465_v49 = vpack.c.bf16 %v519_v39, %v518_v41  ;;  %v242_v50 = vadd.f32 %v1425_v35, %v241_v46  ;;  %v1468_v51 = vpack.c.bf16 %v563_v40, %v562_v43  ;;  %v462_v52 = vadd.f32 %v1425_v35, %v461_v48 }
 0x120   :  { %v521_v53 = vmax.f32 %v247_v45, 0.0  ;;  %v565_v55 = vmax.f32 %v467_v47, 0.0 }
 0x121   :  { %v520_v57 = vmax.f32 %v242_v50, 0.0  ;;  %v1048_v58 = vpop.f32.mrb[12].mxu0  ;;  %v564_v59 = vmax.f32 %v462_v52, 0.0  ;;  %v1114_v60 = vpop.f32.mrb[12].mxu1 }
 0x122   :  { %v257_v61 = vadd.f32 %v1048_v58, %v1425_v35  ;;  %v251_v62 = vpop.f32.mrb[13].mxu0  ;;  %v477_v63 = vadd.f32 %v1114_v60, %v1425_v35  ;;  %v471_v0 = vpop.f32.mrb[13].mxu1 }
 0x123   :  { %v1473_v1 = vpack.c.bf16 %v521_v53, %v520_v57  ;;  %v252_v2 = vadd.f32 %v1425_v35, %v251_v62  ;;  %v1476_v3 = vpack.c.bf16 %v565_v55, %v564_v59  ;;  %v472_v5 = vadd.f32 %v1425_v35, %v471_v0 }
 0x124   :  { %v523_v7 = vmax.f32 %v257_v61, 0.0  ;;  %v567_v8 = vmax.f32 %v477_v63, 0.0 }
 0x125   :  { %v522_v9 = vmax.f32 %v252_v2, 0.0  ;;  %v1051_v10 = vpop.f32.mrb[14].mxu0  ;;  %v566_v11 = vmax.f32 %v472_v5, 0.0  ;;  %v1117_v12 = vpop.f32.mrb[14].mxu1 }
 0x126   :  { %v267_v13 = vadd.f32 %v1051_v10, %v1425_v35  ;;  %v261_v14 = vpop.f32.mrb[15].mxu0  ;;  %v487_v15 = vadd.f32 %v1117_v12, %v1425_v35  ;;  %v481_v16 = vpop.f32.mrb[15].mxu1 }
 0x127   :  { %v1481_v17 = vpack.c.bf16 %v523_v7, %v522_v9  ;;  %v262_v19 = vadd.f32 %v1425_v35, %v261_v14  ;;  %v1484_v21 = vpack.c.bf16 %v567_v8, %v566_v11  ;;  %v482_v22 = vadd.f32 %v1425_v35, %v481_v16 }
 0x128   :  { %v525_v23 = vmax.f32 %v267_v13, 0.0  ;;  %v569_v24 = vmax.f32 %v487_v15, 0.0 }
 0x129   :  { %v524_v25 = vmax.f32 %v262_v19, 0.0  ;;  %v1054_v26 = vpop.f32.mrb[16].mxu0  ;;  %v568_v27 = vmax.f32 %v482_v22, 0.0  ;;  %v1120_v28 = vpop.f32.mrb[16].mxu1 }
 0x12a   :  { %v277_v29 = vadd.f32 %v1054_v26, %v1425_v35  ;;  %v271_v30 = vpop.f32.mrb[17].mxu0  ;;  %v497_v32 = vadd.f32 %v1120_v28, %v1425_v35  ;;  %v491_v36 = vpop.f32.mrb[17].mxu1 }
 0x12b   :  { %v1489_v38 = vpack.c.bf16 %v525_v23, %v524_v25  ;;  %v272_v39 = vadd.f32 %v1425_v35, %v271_v30  ;;  %v1492_v40 = vpack.c.bf16 %v569_v24, %v568_v27  ;;  %v492_v41 = vadd.f32 %v1425_v35, %v491_v36 }
 0x12c   :  { %v527_v42 = vmax.f32 %v277_v29, 0.0  ;;  %v571_v43 = vmax.f32 %v497_v32, 0.0 }
 0x12d   :  { %v526_v44 = vmax.f32 %v272_v39, 0.0  ;;  %v1057_v45 = vpop.f32.mrb[18].mxu0  ;;  %v570_v46 = vmax.f32 %v492_v41, 0.0  ;;  %v1123_v47 = vpop.f32.mrb[18].mxu1 }
 0x12e   :  { %v287_v48 = vadd.f32 %v1057_v45, %v1425_v35  ;;  %v281_v50 = vpop.f32.mrb[19].mxu0  ;;  %v507_v52 = vadd.f32 %v1123_v47, %v1425_v35  ;;  %v501_v53 = vpop.f32.mrb[19].mxu1 }
 0x12f   :  { %v1167_v55 = vpack.c.bf16 %v527_v42, %v526_v44  ;;  %v282_v57 = vadd.f32 %v1425_v35, %v281_v50  ;;  %v1498_v58 = vpack.c.bf16 %v571_v43, %v570_v46  ;;  %v502_v59 = vadd.f32 %v1425_v35, %v501_v53 }
 0x130   :  { %v529_v60 = vmax.f32 %v287_v48, 0.0  ;;  %v573_v61 = vmax.f32 %v507_v52, 0.0 }
 0x131   :  { %v528_v62 = vmax.f32 %v282_v57, 0.0  ;;  %v1060_v63 = vpop.f32.mrb[20].mxu0  ;;  %1168 = vmatprep.subr.bf16.mxu1 %v1167_v55  ;;  %v572_v0 = vmax.f32 %v502_v59, 0.0 }
 0x132   :  { %v297_v2 = vadd.f32 %v1060_v63, %v1425_v35  ;;  %v291_v5 = vpop.f32.mrb[21].mxu0  ;;  %1170 = vmatpush3.bf16.msra.mxu1 %v1433_v54 }
 0x133   :  { %v1171_v7 = vpack.c.bf16 %v529_v60, %v528_v62  ;;  %v292_v8 = vadd.f32 %v1425_v35, %v291_v5  ;;  %v1504_v9 = vpack.c.bf16 %v573_v61, %v572_v0 }
 0x134   :  { %v531_v10 = vmax.f32 %v297_v2, 0.0 }
 0x135   :  { %v530_v11 = vmax.f32 %v292_v8, 0.0  ;;  %v1063_v12 = vpop.f32.mrb[22].mxu0  ;;  %1172 = vmatprep.subr.bf16.mxu1 %v1171_v7  ;;  %v592_v7 = vcombine.high %v1420_v34, %v1420_v34 }
 0x136   :  { %v307_v13 = vadd.f32 %v1063_v12, %v1425_v35  ;;  %v301_v14 = vpop.f32.mrb[23].mxu0  ;;  %1174 = vmatpush3.bf16.msra.mxu1 %v1441_v4 }
 0x137   :  { %v1175_v15 = vpack.c.bf16 %v531_v10, %v530_v11  ;;  %v302_v16 = vadd.f32 %v1425_v35, %v301_v14 }
 0x138   :  { %v533_v19 = vmax.f32 %v307_v13, 0.0 }
 0x139   :  { %v532_v22 = vmax.f32 %v302_v16, 0.0  ;;  %v1066_v54 = vpop.f32.mrb[24].mxu0  ;;  %1176 = vmatprep.subr.bf16.mxu1 %v1175_v15 }
 0x13a   :  { %v317_v23 = vadd.f32 %v1066_v54, %v1425_v35  ;;  %v311_v24 = vpop.f32.mrb[25].mxu0  ;;  %1178 = vmatpush3.bf16.msra.mxu1 %v1449_v18 }
 0x13b   :  { %v1179_v25 = vpack.c.bf16 %v533_v19, %v532_v22  ;;  %v312_v26 = vadd.f32 %v1425_v35, %v311_v24 }
 0x13c   :  { %v535_v27 = vmax.f32 %v317_v23, 0.0 }
 0x13d   :  { %v534_v28 = vmax.f32 %v312_v26, 0.0  ;;  %v1069_v29 = vpop.f32.mrb[26].mxu0  ;;  %1180 = vmatprep.subr.bf16.mxu1 %v1179_v25 }
 0x13e   :  { %v327_v4 = vadd.f32 %v1069_v29, %v1425_v35  ;;  %v321_v30 = vpop.f32.mrb[27].mxu0  ;;  %1182 = vmatpush3.bf16.msra.mxu1 %v1457_v33 }
 0x13f   :  { %v1183_v32 = vpack.c.bf16 %v535_v27, %v534_v28  ;;  %v322_v36 = vadd.f32 %v1425_v35, %v321_v30 }
 0x140   :  { %v537_v39 = vmax.f32 %v327_v4, 0.0 }
 0x141   :  { %v536_v41 = vmax.f32 %v322_v36, 0.0  ;;  %v1072_v42 = vpop.f32.mrb[28].mxu0  ;;  %1184 = vmatprep.subr.bf16.mxu1 %v1183_v32 }
 0x142   :  { %v337_v18 = vadd.f32 %v1072_v42, %v1425_v35  ;;  %v331_v43 = vpop.f32.mrb[29].mxu0  ;;  %1186 = vmatpush3.bf16.msra.mxu1 %v1465_v49 }
 0x143   :  { %v1187_v44 = vpack.c.bf16 %v537_v39, %v536_v41  ;;  %v332_v45 = vadd.f32 %v1425_v35, %v331_v43 }
 0x144   :  { %v539_v46 = vmax.f32 %v337_v18, 0.0 }
 0x145   :  { %v538_v47 = vmax.f32 %v332_v45, 0.0  ;;  %v1075_v48 = vpop.f32.mrb[30].mxu0  ;;  %1188 = vmatprep.subr.bf16.mxu1 %v1187_v44 }
 0x146   :  { %v347_v33 = vadd.f32 %v1075_v48, %v1425_v35  ;;  %v341_v50 = vpop.f32.mrb[31].mxu0  ;;  %1190 = vmatpush3.bf16.msra.mxu1 %v1473_v1 }
 0x147   :  { %v1191_v52 = vpack.c.bf16 %v539_v46, %v538_v47  ;;  %v342_v53 = vadd.f32 %v1425_v35, %v341_v50  ;;  %v839_v50 = vld [vmem:[%s1581_s5] ss:$0 sm:$0xff] }
 0x148   :  { %v541_v55 = vmax.f32 %v347_v33, 0.0 }
 0x149   :  { %v540_v57 = vmax.f32 %v342_v53, 0.0  ;;  %1192 = vmatprep.subr.bf16.mxu1 %v1191_v52  ;;  %v1078_v59 = vpop.f32.mrb[32].mxu0 }
 0x14a   :  { %v357_v49 = vadd.f32 %v1078_v59, %v1425_v35  ;;  %1194 = vmatpush3.bf16.msra.mxu1 %v1481_v17  ;;  %v351_v60 = vpop.f32.mrb[33].mxu0 }
 0x14b   :  { %v1195_v61 = vpack.c.bf16 %v541_v55, %v540_v57  ;;  %v352_v62 = vadd.f32 %v1425_v35, %v351_v60 }
 0x14c   :  { %v543_v63 = vmax.f32 %v357_v49, 0.0 }
 0x14d   :  { %v542_v0 = vmax.f32 %v352_v62, 0.0  ;;  %1196 = vmatprep.subr.bf16.mxu1 %v1195_v61  ;;  %v1081_v2 = vpop.f32.mrb[34].mxu0 }
 0x14e   :  { %v367_v1 = vadd.f32 %v1081_v2, %v1425_v35  ;;  %1198 = vmatpush3.bf16.msra.mxu1 %v1489_v38  ;;  %v361_v5 = vpop.f32.mrb[35].mxu0 }
 0x14f   :  { %v1201_v8 = vpack.c.bf16 %v543_v63, %v542_v0  ;;  %v362_v10 = vadd.f32 %v1425_v35, %v361_v5  ;;  %1200 = vmatprep.subr.bf16.mxu1 %v1452_v20 }
 0x150   :  { %v545_v17 = vmax.f32 %v367_v1, 0.0 }
 0x151   :  { %v544_v11 = vmax.f32 %v362_v10, 0.0  ;;  %v1084_v12 = vpop.f32.mrb[36].mxu0  ;;  %662 = vmatmul.mubr.f32.vlgmr.msra.gmra.mrb[20].mxu1 %v1416_v31 }
 0x152   :  { %v377_v13 = vadd.f32 %v1084_v12, %v1425_v35  ;;  %1202 = vmatpush3.bf16.msra.mxu1 %v1201_v8  ;;  %v371_v14 = vpop.f32.mrb[37].mxu0  ;;  %731 = vmatprep.mubr.f32.mxu1 %v592_v7 }
 0x153   :  { %v1205_v38 = vpack.c.bf16 %v545_v17, %v544_v11  ;;  %v372_v15 = vadd.f32 %v1425_v35, %v371_v14  ;;  %1204 = vmatprep.subr.bf16.mxu1 %v1460_v37 }
 0x154   :  { %v547_v16 = vmax.f32 %v377_v13, 0.0 }
 0x155   :  { %v546_v19 = vmax.f32 %v372_v15, 0.0  ;;  %v1087_v22 = vpop.f32.mrb[38].mxu0 }
 0x156   :  { %v387_v20 = vadd.f32 %v1087_v22, %v1425_v35  ;;  %1206 = vmatpush3.bf16.msra.mxu1 %v1205_v38  ;;  %v381_v54 = vpop.f32.mrb[39].mxu0 }
 0x157   :  { %v1209_v23 = vpack.c.bf16 %v547_v16, %v546_v19  ;;  %v382_v31 = vadd.f32 %v1425_v35, %v381_v54  ;;  %1208 = vmatprep.subr.bf16.mxu1 %v1468_v51 }
 0x158   :  { %v549_v24 = vmax.f32 %v387_v20, 0.0 }
 0x159   :  { %v548_v25 = vmax.f32 %v382_v31, 0.0  ;;  %v1090_v26 = vpop.f32.mrb[40].mxu0 }
 0x15a   :  { %v397_v27 = vadd.f32 %v1090_v26, %v1425_v35  ;;  %1210 = vmatpush3.bf16.msra.mxu1 %v1209_v23  ;;  %v391_v28 = vpop.f32.mrb[41].mxu0 }
 0x15b   :  { %v1213_v37 = vpack.c.bf16 %v549_v24, %v548_v25  ;;  %v392_v29 = vadd.f32 %v1425_v35, %v391_v28  ;;  %1212 = vmatprep.subr.bf16.mxu1 %v1476_v3  ;;  %v738_v3 = vld [vmem:[%s1580_s4 + $0x8] sm:$0xff] }
 0x15c   :  { %v551_v4 = vmax.f32 %v397_v27, 0.0 }
 0x15d   :  { %v550_v30 = vmax.f32 %v392_v29, 0.0  ;;  %v1093_v32 = vpop.f32.mrb[42].mxu0 }
 0x15e   :  { %v407_v36 = vadd.f32 %v1093_v32, %v1425_v35  ;;  %1214 = vmatpush3.bf16.msra.mxu1 %v1213_v37  ;;  %v401_v39 = vpop.f32.mrb[43].mxu0 }
 0x15f   :  { %v1217_v51 = vpack.c.bf16 %v551_v4, %v550_v30  ;;  %v402_v41 = vadd.f32 %v1425_v35, %v401_v39  ;;  %1216 = vmatprep.subr.bf16.mxu1 %v1484_v21  ;;  %v737_v35 = vld [vmem:[%s1580_s4] sm:$0xff]  ;;  %v1314_v21 = vmov 0.0|0.0  }
 0x160   :  { %v553_v42 = vmax.f32 %v407_v36, 0.0 }
 0x161   :  { %v552_v18 = vmax.f32 %v402_v41, 0.0 }
 0x162   :  { %1218 = vmatpush3.bf16.msra.mxu1 %v1217_v51 }
 0x163   :  { %v1221_v43 = vpack.c.bf16 %v553_v42, %v552_v18  ;;  %1220 = vmatprep.subr.bf16.mxu1 %v1492_v40  ;;  %v1232_v40 = vpack.c.bf16 %v738_v3, %v737_v35 }
 0x166   :  { %1222 = vmatpush3.bf16.msra.mxu1 %v1221_v43 }
 0x167   :  { %1224 = vmatprep.subr.bf16.mxu1 %v1498_v58  ;;  %v1316_v58 = vmov 0.0  }
 0x16a   :  { %1226 = vmatpush3.bf16.msra.mxu1 %v1436_v56  ;;  %v739_v56 = vld [vmem:[%s1580_s4 + $0x10] sm:$0xff] }
 0x16b   :  { %1228 = vmatprep.subr.bf16.mxu1 %v1504_v9 }
 0x16e   :  { %1230 = vmatpush3.bf16.msra.mxu1 %v1444_v6 }
 0x16f   :  { %1231 = vmatprep.subr.bf16.mxu1 %v1314_v21 }
 0x171   :  { %732 = vmatmul.mubr.f32.vlgmr.msra.gmra.mrb[22].mxu1 %v1420_v34  ;;  %v740_v34 = vld [vmem:[%s1580_s4 + $0x18] sm:$0xff]  ;;  %s829_s4 = sshll.u32 %s1317_s28, 4  ;;  %s830_s4 = int_to_ptr.vmem [resolvable:$true] %s829_s4 }
 0x172   :  { %1233 = vmatpush3.bf16.msra.mxu1 %v1232_v40  ;;  %v1235_v6 = vpack.c.bf16 %v740_v34, %v739_v56  ;;  %1132 = vmatprep.mubr.msk.f32.mxu1 %vm1315_vm0, %v1316_v58  ;;  %s1284_s29 = scalar_lea.vmem %s830_s4, 32  ;;  %p1289_p9 = scmp.lt.s32.totalorder %s830_s4, %s830_s4 }
 0x173   :  { %1234 = vmatprep.subr.bf16.mxu1 %v1314_v21  ;;  %p1285_p8 = scmp.ne.s32.totalorder %s830_s4, %s1284_s29  ;;  %p1290_p10 = scmp.lt.s32.totalorder %s1284_s29, %s1284_s29 }
 0x175   :  { %p1291_p11 = por %p1290_p10, %p1289_p9 }
 0x176   :  { %1236 = vmatpush3.bf16.msra.mxu1 %v1235_v6 }
 0x177   :  { %p1292_p12 = pnand %p1291_p11, %p1285_p8 }
 0x224   :  { %v953_v9 = vpop.f32.mrb[20].mxu1 }
 0x225   :  { %v954_v44 = vpop.f32.mrb[21].mxu1 }
 0x226   :  { %v955_v45 = vadd.f32 %v954_v44, %v953_v9 }
 0x244   :  { %v988_v46 = vpop.f32.mrb[22].mxu1 }
 0x245   :  { %v989_v47 = vpop.f32.mrb[23].mxu1 }
 0x246   :  { %v990_v48 = vadd.f32 %v989_v47, %v988_v46 }
 0x248   :  { %v734_v33 = vadd.f32 %v990_v48, %v955_v45 }
 0x24a   :  { %1133 = vmatmul.mubr.msk.f32.vlgmr.msra.gmra.mrb[24].mxu1 %vm748_vm1, %v734_v33 }
 0x31d   :  { %v818_v52 = vpop.f32.mrb[24].mxu1 }
 0x31e   :  { %v819_v53 = vadd.f32 %v839_v50, %v818_v52  ;;  %v1134_v55 = vpop.f32.mrb[25].mxu1 }
 0x320   :  { %822 = vst [vmem:[#allocation5] sm:$0x3] %v819_v53 }
 0x321   :  { %1295 = shalt.err (!%p1292_p12)
}
 0x322   :  { %s1296_s8 = scalar_lea.hbm %s1582_s6, 32 }
 0x323   :  { %p1297_p13 = scmp.ne.s32.totalorder %s1582_s6, %s1296_s8  ;;  %p1300_p0 = scmp.lt.u32.totalorder %s1296_s8, %s1582_s6 }
 0x325   :  { %p1302_p1 = pnand %p1300_p0, %p1297_p13 }
 0x327   :  { %1305 = shalt.err (!%p1302_p1)
}
 0x328   :  { %832 = dma.vmem_to_hbm [thread:$0]  %s830_s4, 32, %s1582_s6, [#allocation4]  }
 0x329   :  { %1308 = dma.done.wait [#allocation4], 32  }
 0x32a   :  { %1309 = vsyncadd [#allocation4], 4294967264 }
 0x32b   :  { %836 = vsyncpa [#allocation3], 1 }
 0x32c   :  { %837 = vsyncpa [#allocation4], 1 }

</bundles_post_ra>
